<compile_context>
chip_gen: v6e
topology: v6e:2x2x1
jax: 0.10.0
libtpu: 0.0.40
codegen_flags: <defaults>
</compile_context>

<pallas_src>
import functools

import jax
import jax.numpy as jnp
from jax.experimental import pallas as pl
from jax.experimental.pallas import tpu as pltpu


def _round_up(v, m):
    return (v + m - 1) // m * m


def _sigmoid(v):
    # 1 EUP transcendental per element (vs exp + reciprocal); exact math.
    return 0.5 * jnp.tanh(0.5 * v) + 0.5


def _btlstm_leaf_kernel(x_ref, w_ref, b_ref, cell_ref, hidd_ref, *, hp):
    """x_ref: [TB, D]; w_ref: [D, 3*Hp]; b_ref: [1, 3*Hp];
    cell_ref / hidd_ref: [TB, Hp] f32, lane-dense (Hp % 128 == 0)."""
    x = x_ref[...]

    # Single fused MXU GEMM for all three gates, f32 accumulation + f32 bias.
    z = jnp.dot(x, w_ref[...], preferred_element_type=jnp.float32) + b_ref[...]

    # Gate slices are 128-lane-tile aligned (no lane relayout).
    zi = z[:, :hp]
    zo = z[:, hp:2 * hp]
    zu = z[:, 2 * hp:3 * hp]

    inp = _sigmoid(zi)
    out = _sigmoid(zo)
    upd = jnp.tanh(zu)

    cell = inp * upd
    hidd = out * _sigmoid(cell)

    # Two lane-dense stores (full 128-lane multiples -> unmasked vst).
    cell_ref[...] = cell.astype(cell_ref.dtype)
    hidd_ref[...] = hidd.astype(hidd_ref.dtype)


def fuse_btlstm_leaf_params(wi, bi, wo, bo, wu, bu):
    """Fuse and lane-pad the three gate weights ONCE (call at model init, not per
    forward).  w*: [inp_dim, hid_dim] (transposed vs nn.Linear); b*: [1, hid_dim].

    Returns (w_fused [D, 3*Hp] f32, b_fused [1, 3*Hp] f32, hid_dim), where
    Hp = round_up(hid_dim, 128) so every gate slab is 128-lane aligned.
    """
    hid_dim = wi.shape[1]
    hp = _round_up(hid_dim, 128)

    def pad_lanes(a):
        a = a.astype(jnp.float32)
        if hp != hid_dim:
            a = jnp.pad(a, ((0, 0), (0, hp - hid_dim)))
        return a

    w_fused = jnp.concatenate([pad_lanes(wi), pad_lanes(wo), pad_lanes(wu)], axis=1)
    b_fused = jnp.concatenate(
        [pad_lanes(bi.reshape(1, hid_dim)),
         pad_lanes(bo.reshape(1, hid_dim)),
         pad_lanes(bu.reshape(1, hid_dim))], axis=1)
    return w_fused, b_fused, hid_dim


def btlstm_leaf_forward(x, w_fused, b_fused, hid_dim, *, row_tile=2048):
    """x: [N_rows, inp_dim] (stack as many leaves / batch rows as you like).
    w_fused / b_fused: from fuse_btlstm_leaf_params (prepared once).

    Returns (cell_state, hidd_state), each [N_rows, hid_dim] float32.
    """
    n_rows, inp_dim = x.shape
    gn = w_fused.shape[1]
    hp = gn // 3

    # --- Row tile: as big as a v7x-safe VMEM budget allows (amortizes ~0.35us
    #     per-grid-step pipeline overhead), capped at row_tile and at N.
    streaming_budget = 24 << 20          # double-buffered x + both outputs
    per_row_bytes = 2 * inp_dim * x.dtype.itemsize + 2 * (2 * hp * 4)
    tb = min(row_tile,
             max(8, (streaming_budget // per_row_bytes) // 8 * 8),
             _round_up(n_rows, 8))
    grid = pl.cdiv(n_rows, tb)
    # v7x megacore: split into >=2 grid steps (still-large tiles) when there is
    # enough work so both TensorCores get a share of the "parallel" row axis.
    if grid < 2 and n_rows >= 1024:
        tb = _round_up(pl.cdiv(n_rows, 2), 8)
        grid = pl.cdiv(n_rows, tb)

    # Explicit scoped-VMEM limit (defaults are only 16 MiB v5e / 32 MiB v6e+v7x).
    resident_bytes = 2 * (inp_dim * gn * 4 + 8 * gn * 4)     # fused W + bias, dbl-buffered
    stream_bytes = tb * per_row_bytes
    vmem_limit = min(stream_bytes + resident_bytes + (16 << 20), 64 << 20)

    kernel = functools.partial(_btlstm_leaf_kernel, hp=hp)
    cell_p, hidd_p = pl.pallas_call(
        kernel,
        out_shape=(jax.ShapeDtypeStruct((n_rows, hp), jnp.float32),
                   jax.ShapeDtypeStruct((n_rows, hp), jnp.float32)),
        grid=(grid,),
        in_specs=[
            pl.BlockSpec((tb, inp_dim), lambda i: (i, 0)),   # x rows stream through
            pl.BlockSpec((inp_dim, gn), lambda i: (0, 0)),   # fused weights, VMEM-resident
            pl.BlockSpec((1, gn), lambda i: (0, 0)),         # fused bias, VMEM-resident
            # NOTE: for large D/H, pipeline_mode=pl.Buffered(1) on the two
            # constant-index specs would drop the redundant second weight copy.
        ],
        out_specs=(
            pl.BlockSpec((tb, hp), lambda i: (i, 0)),        # cell, lane-dense
            pl.BlockSpec((tb, hp), lambda i: (i, 0)),        # hidd, lane-dense
        ),
        compiler_params=pltpu.CompilerParams(
            dimension_semantics=("parallel",),               # both v7x TCs usable
            vmem_limit_bytes=int(vmem_limit)),
    )(x, w_fused, b_fused)

    if hp != hid_dim:
        # Only needed when hid_dim is not already a multiple of 128.
        return cell_p[:, :hid_dim], hidd_p[:, :hid_dim]
    return cell_p, hidd_p


def _ref_forward(x, wi, bi, wo, bo, wu, bu):
    """Pure-JAX f32 reference for correctness check."""
    inp = jax.nn.sigmoid(x @ wi + bi)
    out = jax.nn.sigmoid(x @ wo + bo)
    upd = jnp.tanh(x @ wu + bu)
    cell = inp * upd
    hidd = out * jax.nn.sigmoid(cell)
    return cell, hidd


if __name__ == "__main__":
    key = jax.random.PRNGKey(0)
    B, inp_dim, hid_dim = 8, 16, 32
    n_leaves = 32                      # many tree leaves batched into one call

    keys = jax.random.split(key, 8)
    bound = 1.0 / float(jnp.sqrt(inp_dim))   # roughly nn.Linear init scale
    x_single = jax.random.normal(keys[0], (B, inp_dim), dtype=jnp.float32)
    wi = jax.random.uniform(keys[1], (inp_dim, hid_dim), jnp.float32, -bound, bound)
    bi = jax.random.uniform(keys[2], (1, hid_dim), jnp.float32, -bound, bound)
    wo = jax.random.uniform(keys[3], (inp_dim, hid_dim), jnp.float32, -bound, bound)
    bo = jax.random.uniform(keys[4], (1, hid_dim), jnp.float32, -bound, bound)
    wu = jax.random.uniform(keys[5], (inp_dim, hid_dim), jnp.float32, -bound, bound)
    bu = jax.random.uniform(keys[6], (1, hid_dim), jnp.float32, -bound, bound)

    # Many leaves of a tree level stacked into one launch (amortizes overhead).
    x_leaves = jax.random.normal(keys[7], (n_leaves * B, inp_dim), dtype=jnp.float32)

    # One-time weight prep (hoisted out of the per-call path).
    w_fused, b_fused, H = fuse_btlstm_leaf_params(wi, bi, wo, bo, wu, bu)
    jax.block_until_ready((w_fused, b_fused))

    # f32 matmul; default TPU dot precision can differ slightly from XLA's
    # fused reference, so keep a modest tolerance.
    tol = dict(atol=1e-2, rtol=1e-2)

    # Single-leaf (original module shape).
    cell, hidd = btlstm_leaf_forward(x_single, w_fused, b_fused, H)
    jax.block_until_ready((cell, hidd))
    cell_r, hidd_r = _ref_forward(x_single, wi, bi, wo, bo, wu, bu)
    assert cell.shape == (B, hid_dim) and hidd.shape == (B, hid_dim)
    assert jnp.allclose(cell, cell_r, **tol), "cell_state mismatch (single)"
    assert jnp.allclose(hidd, hidd_r, **tol), "hidd_state mismatch (single)"

    # Batched leaves.
    cell_b, hidd_b = btlstm_leaf_forward(x_leaves, w_fused, b_fused, H)
    jax.block_until_ready((cell_b, hidd_b))
    cell_br, hidd_br = _ref_forward(x_leaves, wi, bi, wo, bo, wu, bu)
    assert cell_b.shape == (n_leaves * B, hid_dim)
    assert jnp.allclose(cell_b, cell_br, **tol), "cell_state mismatch (batched)"
    assert jnp.allclose(hidd_b, hidd_br, **tol), "hidd_state mismatch (batched)"

    print("KERNEL_OK")
</pallas_src>

<mosaic_0001>
module attributes {stable_mosaic.version = 11 : i64} {
  func.func @_btlstm_leaf_kernel(%arg0: i32, %arg1: memref<8x16xf32, #tpu.memory_space<vmem>>, %arg2: memref<16x384xf32, #tpu.memory_space<vmem>>, %arg3: memref<1x384xf32, #tpu.memory_space<vmem>>, %arg4: memref<8x128xf32, #tpu.memory_space<vmem>>, %arg5: memref<8x128xf32, #tpu.memory_space<vmem>>) attributes {dimension_semantics = [#tpu.dimension_semantics<parallel>], iteration_bounds = array<i64: 1>, scalar_prefetch = 0 : i64, scratch_operands = 0 : i64, tpu.core_type = #tpu.core_type<tc>, window_params = [{transform_indices = @transform_0, window_bounds = array<i64: 8, 16>}, {pipeline_mode = #tpu.pipeline_mode<synchronous>, transform_indices = @transform_1, window_bounds = array<i64: 16, 384>}, {pipeline_mode = #tpu.pipeline_mode<synchronous>, transform_indices = @transform_2, window_bounds = array<i64: 1, 384>}, {transform_indices = @transform_3, window_bounds = array<i64: 8, 128>}, {transform_indices = @transform_4, window_bounds = array<i64: 8, 128>}]} {
    %c0 = arith.constant 0 : index
    %c0_0 = arith.constant 0 : index
    %0 = vector.load %arg1[%c0, %c0_0] : memref<8x16xf32, #tpu.memory_space<vmem>>, vector<8x16xf32>
    %c0_1 = arith.constant 0 : index
    %c0_2 = arith.constant 0 : index
    %1 = vector.load %arg2[%c0_1, %c0_2] : memref<16x384xf32, #tpu.memory_space<vmem>>, vector<16x384xf32>
    %cst = arith.constant dense<0.000000e+00> : vector<8x384xf32>
    %2 = tpu.matmul %0, %1, %cst {dimension_numbers = #tpu.dot_dimension_numbers<[1], [0], [0], [1], [0, 0, 1, 1], [], []>} : vector<8x16xf32>, vector<16x384xf32>, vector<8x384xf32> -> vector<8x384xf32>
    %c0_3 = arith.constant 0 : index
    %c0_4 = arith.constant 0 : index
    %3 = vector.load %arg3[%c0_3, %c0_4] : memref<1x384xf32, #tpu.memory_space<vmem>>, vector<1x384xf32>
    %4 = vector.broadcast %3 : vector<1x384xf32> to vector<8x384xf32>
    %5 = arith.addf %2, %4 : vector<8x384xf32>
    %6 = vector.extract_strided_slice %5 {offsets = [0, 0], sizes = [8, 128], strides = [1, 1]} : vector<8x384xf32> to vector<8x128xf32>
    %7 = vector.extract_strided_slice %5 {offsets = [0, 128], sizes = [8, 128], strides = [1, 1]} : vector<8x384xf32> to vector<8x128xf32>
    %8 = vector.extract_strided_slice %5 {offsets = [0, 256], sizes = [8, 128], strides = [1, 1]} : vector<8x384xf32> to vector<8x128xf32>
    %cst_5 = arith.constant 5.000000e-01 : f32
    %9 = vector.broadcast %cst_5 : f32 to vector<8x128xf32>
    %10 = arith.mulf %9, %6 : vector<8x128xf32>
    %11 = math.tanh %10 : vector<8x128xf32>
    %cst_6 = arith.constant 5.000000e-01 : f32
    %12 = vector.broadcast %cst_6 : f32 to vector<8x128xf32>
    %13 = arith.mulf %12, %11 : vector<8x128xf32>
    %cst_7 = arith.constant 5.000000e-01 : f32
    %14 = vector.broadcast %cst_7 : f32 to vector<8x128xf32>
    %15 = arith.addf %13, %14 : vector<8x128xf32>
    %cst_8 = arith.constant 5.000000e-01 : f32
    %16 = vector.broadcast %cst_8 : f32 to vector<8x128xf32>
    %17 = arith.mulf %16, %7 : vector<8x128xf32>
    %18 = math.tanh %17 : vector<8x128xf32>
    %cst_9 = arith.constant 5.000000e-01 : f32
    %19 = vector.broadcast %cst_9 : f32 to vector<8x128xf32>
    %20 = arith.mulf %19, %18 : vector<8x128xf32>
    %cst_10 = arith.constant 5.000000e-01 : f32
    %21 = vector.broadcast %cst_10 : f32 to vector<8x128xf32>
    %22 = arith.addf %20, %21 : vector<8x128xf32>
    %23 = math.tanh %8 : vector<8x128xf32>
    %24 = arith.mulf %15, %23 : vector<8x128xf32>
    %cst_11 = arith.constant 5.000000e-01 : f32
    %25 = vector.broadcast %cst_11 : f32 to vector<8x128xf32>
    %26 = arith.mulf %25, %24 : vector<8x128xf32>
    %27 = math.tanh %26 : vector<8x128xf32>
    %cst_12 = arith.constant 5.000000e-01 : f32
    %28 = vector.broadcast %cst_12 : f32 to vector<8x128xf32>
    %29 = arith.mulf %28, %27 : vector<8x128xf32>
    %cst_13 = arith.constant 5.000000e-01 : f32
    %30 = vector.broadcast %cst_13 : f32 to vector<8x128xf32>
    %31 = arith.addf %29, %30 : vector<8x128xf32>
    %32 = arith.mulf %22, %31 : vector<8x128xf32>
    %c0_14 = arith.constant 0 : index
    %c0_15 = arith.constant 0 : index
    %33 = vector.load %arg4[%c0_14, %c0_15] : memref<8x128xf32, #tpu.memory_space<vmem>>, vector<8x128xf32>
    tpu.vector_store %arg4[%c0_14, %c0_15], %24 {strides = array<i32>} : memref<8x128xf32, #tpu.memory_space<vmem>>, vector<8x128xf32>,
    %c0_16 = arith.constant 0 : index
    %c0_17 = arith.constant 0 : index
    %34 = vector.load %arg5[%c0_16, %c0_17] : memref<8x128xf32, #tpu.memory_space<vmem>>, vector<8x128xf32>
    tpu.vector_store %arg5[%c0_16, %c0_17], %32 {strides = array<i32>} : memref<8x128xf32, #tpu.memory_space<vmem>>, vector<8x128xf32>,
    return
  }
  func.func @transform_0(%arg0: i32) -> (i32, i32) {
    %c0_i32 = arith.constant 0 : i32
    %c0_i32_0 = arith.constant 0 : i32
    return %arg0, %c0_i32 : i32, i32
  }
  func.func @transform_1(%arg0: i32) -> (i32, i32) {
    %c0_i32 = arith.constant 0 : i32
    %c0_i32_0 = arith.constant 0 : i32
    %c0_i32_1 = arith.constant 0 : i32
    return %c0_i32, %c0_i32_0 : i32, i32
  }
  func.func @transform_2(%arg0: i32) -> (i32, i32) {
    %c0_i32 = arith.constant 0 : i32
    %c0_i32_0 = arith.constant 0 : i32
    %c0_i32_1 = arith.constant 0 : i32
    return %c0_i32, %c0_i32_0 : i32, i32
  }
  func.func @transform_3(%arg0: i32) -> (i32, i32) {
    %c0_i32 = arith.constant 0 : i32
    %c0_i32_0 = arith.constant 0 : i32
    return %arg0, %c0_i32 : i32, i32
  }
  func.func @transform_4(%arg0: i32) -> (i32, i32) {
    %c0_i32 = arith.constant 0 : i32
    %c0_i32_0 = arith.constant 0 : i32
    return %arg0, %c0_i32 : i32, i32
  }
}

</mosaic_0001>

<bundles_post_ra>
// kernel: tpu_custom_call.1
= control target key start
LH: loop header
LB: loop body
LE: loop exit
PB: predicated region body
PF: predicated region fallthrough
CT: control target
= control target key end

     0   :  { %10 = vsyncpa [#allocation3], 0  ;;  %s424_s0 = inlined_call_operand.hbm [shape: f32[8,16], index: 0, kind: input, shape index: {}]   ;;  %s425_s1 = inlined_call_operand.hbm [shape: f32[16,384], index: 1, kind: input, shape index: {}]   ;;  %s426_s2 = inlined_call_operand.vmem [shape: f32[1,384], index: 2, kind: input, shape index: {}]   ;;  %s427_s3 = inlined_call_operand.hbm [shape: f32[8,128], index: 3, kind: output, shape index: {0}]   ;;  %s428_s4 = inlined_call_operand.hbm [shape: f32[8,128], index: 4, kind: output, shape index: {1}]  }
   0x1   :  { %11 = vsyncpa [#allocation6], 0 }
   0x2   :  { %12 = vsyncpa [#allocation4], 0 }
   0x3   :  { %13 = vsyncpa [#allocation9], 0  ;;  %s376_s15 = smov [#allocation2]   ;;  %s377_s17 = smov [#allocation5]  }
   0x4   :  { %s20_s16 = sshll.u32 %s376_s15, 4  ;;  %s29_s18 = sshll.u32 %s377_s17, 4  ;;  %s21_s16 = int_to_ptr.vmem [resolvable:$true] %s20_s16  ;;  %s30_s18 = int_to_ptr.vmem [resolvable:$true] %s29_s18 }
   0x5   :  { %s296_s19 = scalar_lea.vmem %s21_s16, 128  ;;  %p301_p1 = scmp.lt.s32.totalorder %s21_s16, %s21_s16 }
   0x6   :  { %p297_p0 = scmp.ne.s32.totalorder %s21_s16, %s296_s19  ;;  %p302_p2 = scmp.lt.s32.totalorder %s296_s19, %s296_s19 }
   0x8   :  { %p303_p3 = por %p302_p2, %p301_p1 }
   0xa   :  { %p304_p4 = pnand %p303_p3, %p297_p0 }
   0xc   :  { %307 = shalt.err (!%p304_p4)
}
   0xd   :  { %23 = dma.hbm_to_vmem [thread:$0]  %s424_s0, 128, %s21_s16, [#allocation3]  }
   0xe   :  { %s316_s22 = scalar_lea.vmem %s30_s18, 768  ;;  %p321_p6 = scmp.lt.s32.totalorder %s30_s18, %s30_s18 }
   0xf   :  { %p317_p5 = scmp.ne.s32.totalorder %s30_s18, %s316_s22  ;;  %p322_p7 = scmp.lt.s32.totalorder %s316_s22, %s316_s22 }
  0x11   :  { %p323_p8 = por %p322_p7, %p321_p6 }
  0x13   :  { %p324_p9 = pnand %p323_p8, %p317_p5 }
  0x15   :  { %327 = shalt.err (!%p324_p9)
}
  0x16   :  { %s378_s23 = smov 384   ;;  %s379_s24 = smov 24  }
  0x17   :  { %35 = dma.hbm_to_vmem [thread:$0]  %s425_s1, 768, %s30_s18, [#allocation6], %s378_s23, %s378_s23, %s379_s24  }
  0x18   :  { %368 = dma.done.wait [#allocation3], 128  }
  0x19   :  { %369 = vsyncadd [#allocation3], 4294967168 }
  0x1a   :  { %370 = dma.done.wait [#allocation6], 768  }
  0x1b   :  { %371 = vsyncadd [#allocation6], 4294966528  ;;  %v380_v0 = vmov 0.0   ;;  %vm381_vm0 = vmmov 0   ;;  %v49_v1 = vld [vmem:[#allocation5 + $0x20] sm:$0xff]  ;;  %v48_v2 = vld [vmem:[#allocation5 + $0x18] sm:$0xff]  ;;  %v53_v8 = vlaneseq }
  0x1c   :  { %136 = vmatprep.mubr.f32.mxu0 %v380_v0  ;;  %265 = vmatprep.subr.mxu1 %v380_v0  ;;  %v46_v3 = vld [vmem:[#allocation5 + $0x8] sm:$0xff]  ;;  %v45_v4 = vld [vmem:[#allocation5] sm:$0xff]  ;;  %v44_v6 = vld [vmem:[#allocation2] sm:$0xff]  ;;  %vm68_vm1 = vcmask 130048  }
  0x1d   :  { %269 = vmatprep.mubr.msk.f32.mxu1 %vm381_vm0, %v380_v0  ;;  %100 = vmatprep.subr.mxu0 %v49_v1  ;;  %v50_v5 = vld [vmem:[#allocation5 + $0x28] sm:$0xff]  ;;  %v47_v7 = vld [vmem:[#allocation5 + $0x10] sm:$0xff]  ;;  %v54_v9 = vshrl.u32 %v53_v8, 7  ;;  %v51_v11 = vld [vmem:[%s426_s2] sm:$0x7]  ;;  %s382_s2 = smov [#allocation7]  }
  0x1e   :  { %101 = vmatpush1.msra.mxu0 %v48_v2  ;;  %266 = vmatpush3.msra.mxu1 %v50_v5  ;;  %s236_s27 = sshll.u32 %s382_s2, 4  ;;  %s237_s27 = int_to_ptr.vmem [resolvable:$true] %s236_s27 }
  0x1f   :  { %102 = vmatprep.subr.mxu0 %v46_v3  ;;  %267 = vmatprep.subr.mxu1 %v380_v0  ;;  %v55_v10 = vsub.s32 0, %v54_v9  ;;  %v63_v12 = vsub.s32 2, %v54_v9  ;;  %v59_v21 = vsub.s32 1, %v54_v9  ;;  %s328_s28 = scalar_lea.vmem %s237_s27, 128  ;;  %p333_p11 = scmp.lt.s32.totalorder %s237_s27, %s237_s27 }
  0x20   :  { %103 = vmatpush1.msra.mxu0 %v45_v4  ;;  %268 = vmatpush3.msra.mxu1 %v47_v7  ;;  %p329_p10 = scmp.ne.s32.totalorder %s237_s27, %s328_s28  ;;  %p334_p12 = scmp.lt.s32.totalorder %s328_s28, %s328_s28 }
  0x21   :  { %260 = vmatmul.mubr.msk.f32.vlgmr.msra.gmra.mxu0 %vm68_vm1, %v44_v6  ;;  %270 = vmatmul.mubr.msk.f32.vlgmr.msra.gmra.mxu1 %vm68_vm1, %v44_v6  ;;  %v56_v13 = vrot.slane %v51_v11, %v55_v10  ;;  %v64_v14 = vrot.slane %v51_v11, %v63_v12  ;;  %v60_v22 = vrot.slane %v51_v11, %v59_v21 }
  0x22   :  { %p335_p13 = por %p334_p12, %p333_p11 }
  0x24   :  { %p336_p0 = pnand %p335_p13, %p329_p10 }
  0xe1   :  { %v138_v15 = vpop.f32.mrf.mxu0  ;;  %v209_v16 = vpop.f32.mrf.mxu1 }
  0xe2   :  { %v139_v17 = vadd.f32 %v138_v15, %v56_v13  ;;  %v210_v20 = vadd.f32 %v209_v16, %v64_v14 }
  0xe3   :  { %v271_v18 = vpop.f32.mrf.mxu1  ;;  %v140_v23 = vpop.f32.mrf.mxu0 }
  0xe4   :  { %v213_v19 = vmul.f32 0.5, %v139_v17  ;;  %v141_v24 = vadd.f32 %v140_v23, %v60_v22 }
  0xe6   :  { %280 = vtanh.f32 %v213_v19  ;;  %v217_v27 = vmul.f32 0.5, %v141_v24 }
  0xe7   :  { %282 = vtanh.f32 %v210_v20 }
  0xe8   :  { %284 = vtanh.f32 %v217_v27 }
  0xf3   :  { %v281_v25 = vpop.eup %280 }
  0xf4   :  { %v215_v26 = vmul.f32 0.5, %v281_v25  ;;  %v283_v28 = vpop.eup %282 }
  0xf6   :  { %v216_v29 = vadd.f32 0.5, %v215_v26 }
  0xf8   :  { %v222_v30 = vmul.f32 %v283_v28, %v216_v29 }
  0xfa   :  { %v223_v31 = vmul.f32 0.5, %v222_v30  ;;  %228 = vst [vmem:[#allocation7] sm:$0xff] %v222_v30 }
  0xfb   :  { %339 = shalt.err (!%p336_p0)
}
  0xfc   :  { %239 = dma.vmem_to_hbm [thread:$0]  %s237_s27, 128, %s427_s3, [#allocation4]   ;;  %286 = vtanh.f32 %v223_v31  ;;  %v285_v32 = vpop.eup %284 }
  0xfd   :  { %v219_v33 = vmul.f32 0.5, %v285_v32  ;;  %s383_s5 = smov [#allocation8]  }
  0xfe   :  { %s246_s6 = sshll.u32 %s383_s5, 4  ;;  %s247_s6 = int_to_ptr.vmem [resolvable:$true] %s246_s6 }
  0xff   :  { %v220_v36 = vadd.f32 0.5, %v219_v33  ;;  %s348_s7 = scalar_lea.vmem %s247_s6, 128  ;;  %p353_p2 = scmp.lt.s32.totalorder %s247_s6, %s247_s6 }
 0x100   :  { %p349_p1 = scmp.ne.s32.totalorder %s247_s6, %s348_s7  ;;  %p354_p3 = scmp.lt.s32.totalorder %s348_s7, %s348_s7 }
 0x102   :  { %p355_p4 = por %p354_p3, %p353_p2 }
 0x104   :  { %p356_p5 = pnand %p355_p4, %p349_p1 }
 0x109   :  { %v287_v34 = vpop.eup %286 }
 0x10a   :  { %v225_v35 = vmul.f32 0.5, %v287_v34 }
 0x10c   :  { %v226_v37 = vadd.f32 0.5, %v225_v35 }
 0x10e   :  { %v227_v38 = vmul.f32 %v226_v37, %v220_v36 }
 0x110   :  { %229 = vst [vmem:[#allocation8] sm:$0xff] %v227_v38 }
 0x111   :  { %359 = shalt.err (!%p356_p5)
}
 0x112   :  { %249 = dma.vmem_to_hbm [thread:$0]  %s247_s6, 128, %s428_s4, [#allocation9]  }
 0x113   :  { %372 = dma.done.wait [#allocation4], 128  }
 0x114   :  { %373 = vsyncadd [#allocation4], 4294967168 }
 0x115   :  { %374 = dma.done.wait [#allocation9], 128  }
 0x116   :  { %375 = vsyncadd [#allocation9], 4294967168 }
 0x117   :  { %256 = vsyncpa [#allocation3], 1 }
 0x118   :  { %257 = vsyncpa [#allocation6], 1 }
 0x119   :  { %258 = vsyncpa [#allocation4], 1 }
 0x11a   :  { %259 = vsyncpa [#allocation9], 1 }

</bundles_post_ra>
